<compile_context>
chip_gen: v7x
topology: tpu7x:2x2x1
jax: 0.10.0
libtpu: 0.0.40
codegen_flags: <defaults>
</compile_context>

<pallas_src>
import functools

import jax
import jax.numpy as jnp
from jax import lax
from jax.experimental import pallas as pl
from jax.experimental.pallas import tpu as pltpu


def _dice_ce_kernel(x_ref, t_ref, acc_ref, *, num_classes, r_total,
                    block_rows, out_rows, may_mask):
    """One (batch n, split sp, spatial block s) grid step.

    x_ref   : (C, BR, 128) logits (native dtype, cast to f32 here)
    t_ref   : (BR, 128)    class-id targets (compared in native dtype)
    acc_ref : (out_rows, 128) f32 accumulator, VMEM-resident across grid
              axis 2.  Row layout: [0,C): intersection, [C,2C): softmax sum,
              [2C,3C): one-hot target sum, row 3C: CE sum of -logp[class 0].
    """
    C = num_classes

    @pl.when(pl.program_id(2) == 0)
    def _init():
        acc_ref[...] = jnp.zeros_like(acc_ref)

    def accumulate(valid):
        # Numerically-stable softmax over the class axis; per-class slabs are
        # re-read from the VMEM-resident input block (no xs temporaries).
        m = x_ref[0].astype(jnp.float32)
        for c in range(1, C):
            m = jnp.maximum(m, x_ref[c].astype(jnp.float32))

        es = []
        denom = None
        for c in range(C):
            e = jnp.exp(x_ref[c].astype(jnp.float32) - m)
            es.append(e)
            denom = e if denom is None else denom + e
        # EUP reciprocal: frees VALU ops where VALU is the saturating slot.
        inv = pl.reciprocal(denom, approx=True)
        log_denom = jnp.log(denom)

        t_nat = t_ref[...]                      # native-dtype class ids
        inter_rows, psum_rows, tsum_rows = [], [], []
        for c in range(C):
            p = es[c] * inv
            msk = t_nat == c                    # compare in native dtype
            if valid is not None:
                # Selects (not multiplies) so garbage tail pixels (possibly
                # inf/NaN after exp of stale padding) cannot poison the sums.
                msk = jnp.logical_and(msk, valid)
                p = jnp.where(valid, p, 0.0)
            inter_rows.append(
                jnp.sum(jnp.where(msk, p, 0.0), axis=0, keepdims=True))
            psum_rows.append(jnp.sum(p, axis=0, keepdims=True))
            tsum_rows.append(
                jnp.sum(msk.astype(jnp.float32), axis=0, keepdims=True))

        # CrossEntropyLoss(inputs, targets.argmax(dim=1)): the channel dim of
        # `targets` is a singleton, so argmax(dim=1) == 0 everywhere and each
        # pixel contributes -log_softmax(x)[0] = m + log(denom) - x0.
        ce = (m + log_denom) - x_ref[0].astype(jnp.float32)
        if valid is not None:
            ce = jnp.where(valid, ce, 0.0)
        ce_row = jnp.sum(ce, axis=0, keepdims=True)

        # Coalesce the (3C+1) per-row partial sums into a single full-tile,
        # unmasked RMW on the accumulator (no per-row vst.msk updates).
        rows = inter_rows + psum_rows + tsum_rows + [ce_row]
        row_ids = lax.broadcasted_iota(jnp.int32, (out_rows, 128), 0)
        partial = jnp.zeros((out_rows, 128), jnp.float32)
        for i, row in enumerate(rows):
            partial = partial + jnp.where(row_ids == i, row, 0.0)
        acc_ref[...] += partial

    if may_mask:
        # Only tail / overhang blocks pay the mask cost; full blocks take the
        # unmasked path.
        blk = pl.program_id(1) * pl.num_programs(2) + pl.program_id(2)
        start_row = blk * block_rows
        needs_mask = start_row + block_rows > r_total

        @pl.when(jnp.logical_not(needs_mask))
        def _full():
            accumulate(None)

        @pl.when(needs_mask)
        def _tail():
            row_ids = lax.broadcasted_iota(jnp.int32, (block_rows, 128), 0)
            accumulate(row_ids < (r_total - start_row))
    else:
        accumulate(None)


@jax.jit
def dice_loss_w_softmax(inputs, targets):
    """inputs: (N, C, D, H, W) logits ; targets: (N, 1, D, H, W) class ids.

    Both streams keep their native HBM dtype (cast happens in-kernel), so on
    bandwidth-bound parts (v5e) callers should keep logits in bf16 and targets
    in int8/int32 -- do NOT pre-cast in a wrapper (extra HBM pass).
    Targets must hold exact integer class ids (matches torch .long()).
    """
    N, C, D, H, W = inputs.shape
    S = D * H * W
    # TODO(synk): add lane-tail masking so volumes with D*H*W % 128 != 0 work.
    assert S % 128 == 0, "D*H*W must be a multiple of 128"
    r_total = S // 128

    # Lane-dense layout: pixels on (sublane_rows, 128 lanes), one full slab per
    # class.  Pure reshapes, no extra HBM pass.
    x = inputs.reshape(N, C, r_total, 128)
    t = targets.reshape(N, r_total, 128)

    # VMEM-budgeted block sizing (valid even on v7x's 64 MiB part): two
    # double-buffered input blocks plus ~(C+6) live (rows, 128) f32
    # intermediates per row of 128 lanes, against a conservative 24 MiB.
    row_bytes = 128 * (2 * (C * x.dtype.itemsize + t.dtype.itemsize)
                       + (C + 6) * 4)
    budget = 24 * 1024 * 1024
    target_rows = max(8, min(1024, ((budget // row_bytes) // 8) * 8))

    if r_total <= target_rows:
        block_rows = r_total
    else:
        # Prefer a multiple-of-8 divisor of r_total so no block needs masking.
        block_rows = 0
        if r_total % 8 == 0:
            for cand in range(target_rows, max(target_rows // 2, 8) - 1, -8):
                if r_total % cand == 0:
                    block_rows = cand
                    break
        if block_rows == 0:
            block_rows = target_rows      # tail handled via pl.when mask path

    n_blk = pl.cdiv(r_total, block_rows)
    # Keep both TensorCores busy (v7x): split spatially whenever the batch
    # axis alone can't give an even number of parallel work units.
    split = 2 if (N % 2 == 1 and n_blk >= 2) else 1
    steps = pl.cdiv(n_blk, split)
    may_mask = (r_total % block_rows != 0) or (n_blk % split != 0)

    out_rows = ((3 * C + 1 + 7) // 8) * 8

    def x_index(n, sp, s):
        return (n, 0, jnp.minimum(sp * steps + s, n_blk - 1), 0)

    def t_index(n, sp, s):
        return (n, jnp.minimum(sp * steps + s, n_blk - 1), 0)

    kernel = functools.partial(
        _dice_ce_kernel, num_classes=C, r_total=r_total,
        block_rows=block_rows, out_rows=out_rows, may_mask=may_mask)

    partials = pl.pallas_call(
        kernel,
        out_shape=jax.ShapeDtypeStruct((N, split, out_rows, 128), jnp.float32),
        grid=(N, split, steps),
        in_specs=[
            pl.BlockSpec((None, C, block_rows, 128), x_index),
            pl.BlockSpec((None, block_rows, 128), t_index),
        ],
        out_specs=pl.BlockSpec((None, None, out_rows, 128),
                               lambda n, sp, s: (n, sp, 0, 0)),
        compiler_params=pltpu.CompilerParams(
            dimension_semantics=("parallel", "parallel", "arbitrary"),
            vmem_limit_bytes=48 * 1024 * 1024),
    )(x, t)

    # Tiny glue: reduce lane/split partials and combine to the scalar loss.
    tot = jnp.sum(partials, axis=(1, 3))                      # (N, out_rows)
    inter = tot[:, 0:C]
    psum = tot[:, C:2 * C]
    tsum = tot[:, 2 * C:3 * C]
    ce_sum = jnp.sum(tot[:, 3 * C])

    eps = jnp.finfo(jnp.float32).eps       # == torch.finfo(torch.float32).eps
    dice_score = (2.0 * inter + eps) / (psum + tsum + eps)
    dice_loss = 1.0 - jnp.mean(dice_score)
    ce_loss = ce_sum / (N * S)             # CrossEntropyLoss 'mean' reduction
    return 0.7 * dice_loss + 0.3 * ce_loss


def _reference(inputs, targets):
    """Pure-JAX mirror of the PyTorch forward for verification."""
    N, C, D, H, W = inputs.shape
    eps = jnp.finfo(jnp.float32).eps
    xf = inputs.astype(jnp.float32)
    p = jax.nn.softmax(xf, axis=1)
    lbl = targets[:, 0].astype(jnp.int32)                     # (N, D, H, W)
    oh = jnp.moveaxis(jax.nn.one_hot(lbl, C, dtype=jnp.float32), -1, 1)
    inter = jnp.sum(p * oh, axis=(2, 3, 4))
    dice = (2.0 * inter + eps) / (
        p.sum(axis=(2, 3, 4)) + oh.sum(axis=(2, 3, 4)) + eps)
    dice_loss = 1.0 - jnp.mean(dice)
    ce_t = jnp.argmax(targets, axis=1)                        # all zeros
    oh_ce = jnp.moveaxis(jax.nn.one_hot(ce_t, C, dtype=jnp.float32), -1, 1)
    logp = jax.nn.log_softmax(xf, axis=1)
    ce_loss = -jnp.mean(jnp.sum(oh_ce * logp, axis=1))
    return 0.7 * dice_loss + 0.3 * ce_loss


if __name__ == "__main__":
    # Small shapes consistent with the (N, C, D, H, W) forward.
    N, C, D, H, W = 2, 4, 4, 8, 8
    key = jax.random.PRNGKey(0)
    k_x, k_t = jax.random.split(key)
    inputs = jax.random.normal(k_x, (N, C, D, H, W), dtype=jnp.float32)
    targets = jax.random.randint(k_t, (N, 1, D, H, W), 0, C).astype(jnp.float32)

    loss = jax.block_until_ready(dice_loss_w_softmax(inputs, targets))
    ref = jax.block_until_ready(_reference(inputs, targets))
    # Tolerance accounts for the EUP approximate reciprocal in the softmax.
    assert jnp.allclose(loss, ref, rtol=3e-3, atol=1e-5), (loss, ref)
    print("KERNEL_OK")
</pallas_src>

<mosaic_0001>
module attributes {stable_mosaic.version = 11 : i64} {
  func.func @_dice_ce_kernel(%arg0: i32, %arg1: i32, %arg2: i32, %arg3: memref<1x4x2x128xf32, #tpu.memory_space<vmem>>, %arg4: memref<1x2x128xf32, #tpu.memory_space<vmem>>, %arg5: memref<1x1x16x128xf32, #tpu.memory_space<vmem>>) attributes {dimension_semantics = [#tpu.dimension_semantics<parallel>, #tpu.dimension_semantics<parallel>, #tpu.dimension_semantics<arbitrary>], iteration_bounds = array<i64: 2, 1, 1>, scalar_prefetch = 0 : i64, scratch_operands = 0 : i64, tpu.core_type = #tpu.core_type<tc>, window_params = [{transform_indices = @transform_0, window_bounds = array<i64: 1, 4, 2, 128>}, {transform_indices = @transform_1, window_bounds = array<i64: 1, 2, 128>}, {transform_indices = @transform_2, window_bounds = array<i64: 1, 1, 16, 128>}]} {
    %c0_i32 = arith.constant 0 : i32
    %0 = arith.cmpi eq, %arg2, %c0_i32 : i32
    %1 = arith.extui %0 : i1 to i32
    %c0_i32_0 = arith.constant 0 : i32
    %2 = arith.cmpi ne, %1, %c0_i32_0 : i32
    scf.if %2 {
      %cst_79 = arith.constant 0.000000e+00 : f32
      %194 = vector.broadcast %cst_79 : f32 to vector<16x128xf32>
      %c0_80 = arith.constant 0 : index
      %c0_81 = arith.constant 0 : index
      %c0_82 = arith.constant 0 : index
      %c0_83 = arith.constant 0 : index
      %195 = vector.load %arg5[%c0_80, %c0_81, %c0_82, %c0_83] : memref<1x1x16x128xf32, #tpu.memory_space<vmem>>, vector<1x1x16x128xf32>
      %196 = vector.shape_cast %195 : vector<1x1x16x128xf32> to vector<16x128xf32>
      %197 = vector.shape_cast %194 : vector<16x128xf32> to vector<1x1x16x128xf32>
      tpu.vector_store %arg5[%c0_80, %c0_81, %c0_82, %c0_83], %197 {strides = array<i32>} : memref<1x1x16x128xf32, #tpu.memory_space<vmem>>, vector<1x1x16x128xf32>,
    } else {
    }
    %c0 = arith.constant 0 : index
    %c0_1 = arith.constant 0 : index
    %c0_2 = arith.constant 0 : index
    %c0_3 = arith.constant 0 : index
    %3 = vector.load %arg3[%c0, %c0_1, %c0_2, %c0_3] : memref<1x4x2x128xf32, #tpu.memory_space<vmem>>, vector<1x1x2x128xf32>
    %4 = vector.shape_cast %3 : vector<1x1x2x128xf32> to vector<2x128xf32>
    %c0_4 = arith.constant 0 : index
    %c1 = arith.constant 1 : index
    %c0_5 = arith.constant 0 : index
    %c0_6 = arith.constant 0 : index
    %5 = vector.load %arg3[%c0_4, %c1, %c0_5, %c0_6] : memref<1x4x2x128xf32, #tpu.memory_space<vmem>>, vector<1x1x2x128xf32>
    %6 = vector.shape_cast %5 : vector<1x1x2x128xf32> to vector<2x128xf32>
    %7 = arith.maximumf %4, %6 : vector<2x128xf32>
    %c0_7 = arith.constant 0 : index
    %c2 = arith.constant 2 : index
    %c0_8 = arith.constant 0 : index
    %c0_9 = arith.constant 0 : index
    %8 = vector.load %arg3[%c0_7, %c2, %c0_8, %c0_9] : memref<1x4x2x128xf32, #tpu.memory_space<vmem>>, vector<1x1x2x128xf32>
    %9 = vector.shape_cast %8 : vector<1x1x2x128xf32> to vector<2x128xf32>
    %10 = arith.maximumf %7, %9 : vector<2x128xf32>
    %c0_10 = arith.constant 0 : index
    %c3 = arith.constant 3 : index
    %c0_11 = arith.constant 0 : index
    %c0_12 = arith.constant 0 : index
    %11 = vector.load %arg3[%c0_10, %c3, %c0_11, %c0_12] : memref<1x4x2x128xf32, #tpu.memory_space<vmem>>, vector<1x1x2x128xf32>
    %12 = vector.shape_cast %11 : vector<1x1x2x128xf32> to vector<2x128xf32>
    %13 = arith.maximumf %10, %12 : vector<2x128xf32>
    %c0_13 = arith.constant 0 : index
    %c0_14 = arith.constant 0 : index
    %c0_15 = arith.constant 0 : index
    %c0_16 = arith.constant 0 : index
    %14 = vector.load %arg3[%c0_13, %c0_14, %c0_15, %c0_16] : memref<1x4x2x128xf32, #tpu.memory_space<vmem>>, vector<1x1x2x128xf32>
    %15 = vector.shape_cast %14 : vector<1x1x2x128xf32> to vector<2x128xf32>
    %16 = arith.subf %15, %13 : vector<2x128xf32>
    %17 = math.exp %16 : vector<2x128xf32>
    %c0_17 = arith.constant 0 : index
    %c1_18 = arith.constant 1 : index
    %c0_19 = arith.constant 0 : index
    %c0_20 = arith.constant 0 : index
    %18 = vector.load %arg3[%c0_17, %c1_18, %c0_19, %c0_20] : memref<1x4x2x128xf32, #tpu.memory_space<vmem>>, vector<1x1x2x128xf32>
    %19 = vector.shape_cast %18 : vector<1x1x2x128xf32> to vector<2x128xf32>
    %20 = arith.subf %19, %13 : vector<2x128xf32>
    %21 = math.exp %20 : vector<2x128xf32>
    %22 = arith.addf %17, %21 : vector<2x128xf32>
    %c0_21 = arith.constant 0 : index
    %c2_22 = arith.constant 2 : index
    %c0_23 = arith.constant 0 : index
    %c0_24 = arith.constant 0 : index
    %23 = vector.load %arg3[%c0_21, %c2_22, %c0_23, %c0_24] : memref<1x4x2x128xf32, #tpu.memory_space<vmem>>, vector<1x1x2x128xf32>
    %24 = vector.shape_cast %23 : vector<1x1x2x128xf32> to vector<2x128xf32>
    %25 = arith.subf %24, %13 : vector<2x128xf32>
    %26 = math.exp %25 : vector<2x128xf32>
    %27 = arith.addf %22, %26 : vector<2x128xf32>
    %c0_25 = arith.constant 0 : index
    %c3_26 = arith.constant 3 : index
    %c0_27 = arith.constant 0 : index
    %c0_28 = arith.constant 0 : index
    %28 = vector.load %arg3[%c0_25, %c3_26, %c0_27, %c0_28] : memref<1x4x2x128xf32, #tpu.memory_space<vmem>>, vector<1x1x2x128xf32>
    %29 = vector.shape_cast %28 : vector<1x1x2x128xf32> to vector<2x128xf32>
    %30 = arith.subf %29, %13 : vector<2x128xf32>
    %31 = math.exp %30 : vector<2x128xf32>
    %32 = arith.addf %27, %31 : vector<2x128xf32>
    %33 = tpu.reciprocal %32 {approx = true} : vector<2x128xf32> -> vector<2x128xf32>
    %34 = math.log %32 : vector<2x128xf32>
    %c0_29 = arith.constant 0 : index
    %c0_30 = arith.constant 0 : index
    %c0_31 = arith.constant 0 : index
    %35 = vector.load %arg4[%c0_29, %c0_30, %c0_31] : memref<1x2x128xf32, #tpu.memory_space<vmem>>, vector<1x2x128xf32>
    %36 = vector.shape_cast %35 : vector<1x2x128xf32> to vector<2x128xf32>
    %37 = arith.mulf %17, %33 : vector<2x128xf32>
    %cst = arith.constant 0.000000e+00 : f32
    %38 = vector.broadcast %cst : f32 to vector<2x128xf32>
    %39 = arith.cmpf oeq, %36, %38 : vector<2x128xf32>
    %cst_32 = arith.constant 0.000000e+00 : f32
    %40 = vector.broadcast %cst_32 : f32 to vector<2x128xf32>
    %41 = arith.select %39, %37, %40 : vector<2x128xi1>, vector<2x128xf32>
    %cst_33 = arith.constant dense<0.000000e+00> : vector<128xf32>
    %42 = vector.multi_reduction <add>, %41, %cst_33 [0] : vector<2x128xf32> to vector<128xf32>
    %43 = vector.shape_cast %42 : vector<128xf32> to vector<1x128xf32>
    %cst_34 = arith.constant dense<0.000000e+00> : vector<128xf32>
    %44 = vector.multi_reduction <add>, %37, %cst_34 [0] : vector<2x128xf32> to vector<128xf32>
    %45 = vector.shape_cast %44 : vector<128xf32> to vector<1x128xf32>
    %46 = arith.extui %39 : vector<2x128xi1> to vector<2x128xi32>
    %47 = arith.sitofp %46 : vector<2x128xi32> to vector<2x128xf32>
    %cst_35 = arith.constant dense<0.000000e+00> : vector<128xf32>
    %48 = vector.multi_reduction <add>, %47, %cst_35 [0] : vector<2x128xf32> to vector<128xf32>
    %49 = vector.shape_cast %48 : vector<128xf32> to vector<1x128xf32>
    %50 = arith.mulf %21, %33 : vector<2x128xf32>
    %cst_36 = arith.constant 1.000000e+00 : f32
    %51 = vector.broadcast %cst_36 : f32 to vector<2x128xf32>
    %52 = arith.cmpf oeq, %36, %51 : vector<2x128xf32>
    %cst_37 = arith.constant 0.000000e+00 : f32
    %53 = vector.broadcast %cst_37 : f32 to vector<2x128xf32>
    %54 = arith.select %52, %50, %53 : vector<2x128xi1>, vector<2x128xf32>
    %cst_38 = arith.constant dense<0.000000e+00> : vector<128xf32>
    %55 = vector.multi_reduction <add>, %54, %cst_38 [0] : vector<2x128xf32> to vector<128xf32>
    %56 = vector.shape_cast %55 : vector<128xf32> to vector<1x128xf32>
    %cst_39 = arith.constant dense<0.000000e+00> : vector<128xf32>
    %57 = vector.multi_reduction <add>, %50, %cst_39 [0] : vector<2x128xf32> to vector<128xf32>
    %58 = vector.shape_cast %57 : vector<128xf32> to vector<1x128xf32>
    %59 = arith.extui %52 : vector<2x128xi1> to vector<2x128xi32>
    %60 = arith.sitofp %59 : vector<2x128xi32> to vector<2x128xf32>
    %cst_40 = arith.constant dense<0.000000e+00> : vector<128xf32>
    %61 = vector.multi_reduction <add>, %60, %cst_40 [0] : vector<2x128xf32> to vector<128xf32>
    %62 = vector.shape_cast %61 : vector<128xf32> to vector<1x128xf32>
    %63 = arith.mulf %26, %33 : vector<2x128xf32>
    %cst_41 = arith.constant 2.000000e+00 : f32
    %64 = vector.broadcast %cst_41 : f32 to vector<2x128xf32>
    %65 = arith.cmpf oeq, %36, %64 : vector<2x128xf32>
    %cst_42 = arith.constant 0.000000e+00 : f32
    %66 = vector.broadcast %cst_42 : f32 to vector<2x128xf32>
    %67 = arith.select %65, %63, %66 : vector<2x128xi1>, vector<2x128xf32>
    %cst_43 = arith.constant dense<0.000000e+00> : vector<128xf32>
    %68 = vector.multi_reduction <add>, %67, %cst_43 [0] : vector<2x128xf32> to vector<128xf32>
    %69 = vector.shape_cast %68 : vector<128xf32> to vector<1x128xf32>
    %cst_44 = arith.constant dense<0.000000e+00> : vector<128xf32>
    %70 = vector.multi_reduction <add>, %63, %cst_44 [0] : vector<2x128xf32> to vector<128xf32>
    %71 = vector.shape_cast %70 : vector<128xf32> to vector<1x128xf32>
    %72 = arith.extui %65 : vector<2x128xi1> to vector<2x128xi32>
    %73 = arith.sitofp %72 : vector<2x128xi32> to vector<2x128xf32>
    %cst_45 = arith.constant dense<0.000000e+00> : vector<128xf32>
    %74 = vector.multi_reduction <add>, %73, %cst_45 [0] : vector<2x128xf32> to vector<128xf32>
    %75 = vector.shape_cast %74 : vector<128xf32> to vector<1x128xf32>
    %76 = arith.mulf %31, %33 : vector<2x128xf32>
    %cst_46 = arith.constant 3.000000e+00 : f32
    %77 = vector.broadcast %cst_46 : f32 to vector<2x128xf32>
    %78 = arith.cmpf oeq, %36, %77 : vector<2x128xf32>
    %cst_47 = arith.constant 0.000000e+00 : f32
    %79 = vector.broadcast %cst_47 : f32 to vector<2x128xf32>
    %80 = arith.select %78, %76, %79 : vector<2x128xi1>, vector<2x128xf32>
    %cst_48 = arith.constant dense<0.000000e+00> : vector<128xf32>
    %81 = vector.multi_reduction <add>, %80, %cst_48 [0] : vector<2x128xf32> to vector<128xf32>
    %82 = vector.shape_cast %81 : vector<128xf32> to vector<1x128xf32>
    %cst_49 = arith.constant dense<0.000000e+00> : vector<128xf32>
    %83 = vector.multi_reduction <add>, %76, %cst_49 [0] : vector<2x128xf32> to vector<128xf32>
    %84 = vector.shape_cast %83 : vector<128xf32> to vector<1x128xf32>
    %85 = arith.extui %78 : vector<2x128xi1> to vector<2x128xi32>
    %86 = arith.sitofp %85 : vector<2x128xi32> to vector<2x128xf32>
    %cst_50 = arith.constant dense<0.000000e+00> : vector<128xf32>
    %87 = vector.multi_reduction <add>, %86, %cst_50 [0] : vector<2x128xf32> to vector<128xf32>
    %88 = vector.shape_cast %87 : vector<128xf32> to vector<1x128xf32>
    %89 = arith.addf %13, %34 : vector<2x128xf32>
    %c0_51 = arith.constant 0 : index
    %c0_52 = arith.constant 0 : index
    %c0_53 = arith.constant 0 : index
    %c0_54 = arith.constant 0 : index
    %90 = vector.load %arg3[%c0_51, %c0_52, %c0_53, %c0_54] : memref<1x4x2x128xf32, #tpu.memory_space<vmem>>, vector<1x1x2x128xf32>
    %91 = vector.shape_cast %90 : vector<1x1x2x128xf32> to vector<2x128xf32>
    %92 = arith.subf %89, %91 : vector<2x128xf32>
    %cst_55 = arith.constant dense<0.000000e+00> : vector<128xf32>
    %93 = vector.multi_reduction <add>, %92, %cst_55 [0] : vector<2x128xf32> to vector<128xf32>
    %94 = vector.shape_cast %93 : vector<128xf32> to vector<1x128xf32>
    %95 = tpu.iota {dimensions = array<i32: 0>} : vector<16x128xi32>
    %cst_56 = arith.constant 0.000000e+00 : f32
    %96 = vector.broadcast %cst_56 : f32 to vector<16x128xf32>
    %c0_i32_57 = arith.constant 0 : i32
    %97 = vector.broadcast %c0_i32_57 : i32 to vector<16x128xi32>
    %98 = arith.cmpi eq, %95, %97 : vector<16x128xi32>
    %cst_58 = arith.constant 0.000000e+00 : f32
    %99 = vector.shape_cast %43 : vector<1x128xf32> to vector<1x128xf32>
    %100 = vector.broadcast %99 : vector<1x128xf32> to vector<16x128xf32>
    %101 = vector.broadcast %cst_58 : f32 to vector<16x128xf32>
    %102 = arith.select %98, %100, %101 : vector<16x128xi1>, vector<16x128xf32>
    %103 = arith.addf %96, %102 : vector<16x128xf32>
    %c1_i32 = arith.constant 1 : i32
    %104 = vector.broadcast %c1_i32 : i32 to vector<16x128xi32>
    %105 = arith.cmpi eq, %95, %104 : vector<16x128xi32>
    %cst_59 = arith.constant 0.000000e+00 : f32
    %106 = vector.shape_cast %56 : vector<1x128xf32> to vector<1x128xf32>
    %107 = vector.broadcast %106 : vector<1x128xf32> to vector<16x128xf32>
    %108 = vector.broadcast %cst_59 : f32 to vector<16x128xf32>
    %109 = arith.select %105, %107, %108 : vector<16x128xi1>, vector<16x128xf32>
    %110 = arith.addf %103, %109 : vector<16x128xf32>
    %c2_i32 = arith.constant 2 : i32
    %111 = vector.broadcast %c2_i32 : i32 to vector<16x128xi32>
    %112 = arith.cmpi eq, %95, %111 : vector<16x128xi32>
    %cst_60 = arith.constant 0.000000e+00 : f32
    %113 = vector.shape_cast %69 : vector<1x128xf32> to vector<1x128xf32>
    %114 = vector.broadcast %113 : vector<1x128xf32> to vector<16x128xf32>
    %115 = vector.broadcast %cst_60 : f32 to vector<16x128xf32>
    %116 = arith.select %112, %114, %115 : vector<16x128xi1>, vector<16x128xf32>
    %117 = arith.addf %110, %116 : vector<16x128xf32>
    %c3_i32 = arith.constant 3 : i32
    %118 = vector.broadcast %c3_i32 : i32 to vector<16x128xi32>
    %119 = arith.cmpi eq, %95, %118 : vector<16x128xi32>
    %cst_61 = arith.constant 0.000000e+00 : f32
    %120 = vector.shape_cast %82 : vector<1x128xf32> to vector<1x128xf32>
    %121 = vector.broadcast %120 : vector<1x128xf32> to vector<16x128xf32>
    %122 = vector.broadcast %cst_61 : f32 to vector<16x128xf32>
    %123 = arith.select %119, %121, %122 : vector<16x128xi1>, vector<16x128xf32>
    %124 = arith.addf %117, %123 : vector<16x128xf32>
    %c4_i32 = arith.constant 4 : i32
    %125 = vector.broadcast %c4_i32 : i32 to vector<16x128xi32>
    %126 = arith.cmpi eq, %95, %125 : vector<16x128xi32>
    %cst_62 = arith.constant 0.000000e+00 : f32
    %127 = vector.shape_cast %45 : vector<1x128xf32> to vector<1x128xf32>
    %128 = vector.broadcast %127 : vector<1x128xf32> to vector<16x128xf32>
    %129 = vector.broadcast %cst_62 : f32 to vector<16x128xf32>
    %130 = arith.select %126, %128, %129 : vector<16x128xi1>, vector<16x128xf32>
    %131 = arith.addf %124, %130 : vector<16x128xf32>
    %c5_i32 = arith.constant 5 : i32
    %132 = vector.broadcast %c5_i32 : i32 to vector<16x128xi32>
    %133 = arith.cmpi eq, %95, %132 : vector<16x128xi32>
    %cst_63 = arith.constant 0.000000e+00 : f32
    %134 = vector.shape_cast %58 : vector<1x128xf32> to vector<1x128xf32>
    %135 = vector.broadcast %134 : vector<1x128xf32> to vector<16x128xf32>
    %136 = vector.broadcast %cst_63 : f32 to vector<16x128xf32>
    %137 = arith.select %133, %135, %136 : vector<16x128xi1>, vector<16x128xf32>
    %138 = arith.addf %131, %137 : vector<16x128xf32>
    %c6_i32 = arith.constant 6 : i32
    %139 = vector.broadcast %c6_i32 : i32 to vector<16x128xi32>
    %140 = arith.cmpi eq, %95, %139 : vector<16x128xi32>
    %cst_64 = arith.constant 0.000000e+00 : f32
    %141 = vector.shape_cast %71 : vector<1x128xf32> to vector<1x128xf32>
    %142 = vector.broadcast %141 : vector<1x128xf32> to vector<16x128xf32>
    %143 = vector.broadcast %cst_64 : f32 to vector<16x128xf32>
    %144 = arith.select %140, %142, %143 : vector<16x128xi1>, vector<16x128xf32>
    %145 = arith.addf %138, %144 : vector<16x128xf32>
    %c7_i32 = arith.constant 7 : i32
    %146 = vector.broadcast %c7_i32 : i32 to vector<16x128xi32>
    %147 = arith.cmpi eq, %95, %146 : vector<16x128xi32>
    %cst_65 = arith.constant 0.000000e+00 : f32
    %148 = vector.shape_cast %84 : vector<1x128xf32> to vector<1x128xf32>
    %149 = vector.broadcast %148 : vector<1x128xf32> to vector<16x128xf32>
    %150 = vector.broadcast %cst_65 : f32 to vector<16x128xf32>
    %151 = arith.select %147, %149, %150 : vector<16x128xi1>, vector<16x128xf32>
    %152 = arith.addf %145, %151 : vector<16x128xf32>
    %c8_i32 = arith.constant 8 : i32
    %153 = vector.broadcast %c8_i32 : i32 to vector<16x128xi32>
    %154 = arith.cmpi eq, %95, %153 : vector<16x128xi32>
    %cst_66 = arith.constant 0.000000e+00 : f32
    %155 = vector.shape_cast %49 : vector<1x128xf32> to vector<1x128xf32>
    %156 = vector.broadcast %155 : vector<1x128xf32> to vector<16x128xf32>
    %157 = vector.broadcast %cst_66 : f32 to vector<16x128xf32>
    %158 = arith.select %154, %156, %157 : vector<16x128xi1>, vector<16x128xf32>
    %159 = arith.addf %152, %158 : vector<16x128xf32>
    %c9_i32 = arith.constant 9 : i32
    %160 = vector.broadcast %c9_i32 : i32 to vector<16x128xi32>
    %161 = arith.cmpi eq, %95, %160 : vector<16x128xi32>
    %cst_67 = arith.constant 0.000000e+00 : f32
    %162 = vector.shape_cast %62 : vector<1x128xf32> to vector<1x128xf32>
    %163 = vector.broadcast %162 : vector<1x128xf32> to vector<16x128xf32>
    %164 = vector.broadcast %cst_67 : f32 to vector<16x128xf32>
    %165 = arith.select %161, %163, %164 : vector<16x128xi1>, vector<16x128xf32>
    %166 = arith.addf %159, %165 : vector<16x128xf32>
    %c10_i32 = arith.constant 10 : i32
    %167 = vector.broadcast %c10_i32 : i32 to vector<16x128xi32>
    %168 = arith.cmpi eq, %95, %167 : vector<16x128xi32>
    %cst_68 = arith.constant 0.000000e+00 : f32
    %169 = vector.shape_cast %75 : vector<1x128xf32> to vector<1x128xf32>
    %170 = vector.broadcast %169 : vector<1x128xf32> to vector<16x128xf32>
    %171 = vector.broadcast %cst_68 : f32 to vector<16x128xf32>
    %172 = arith.select %168, %170, %171 : vector<16x128xi1>, vector<16x128xf32>
    %173 = arith.addf %166, %172 : vector<16x128xf32>
    %c11_i32 = arith.constant 11 : i32
    %174 = vector.broadcast %c11_i32 : i32 to vector<16x128xi32>
    %175 = arith.cmpi eq, %95, %174 : vector<16x128xi32>
    %cst_69 = arith.constant 0.000000e+00 : f32
    %176 = vector.shape_cast %88 : vector<1x128xf32> to vector<1x128xf32>
    %177 = vector.broadcast %176 : vector<1x128xf32> to vector<16x128xf32>
    %178 = vector.broadcast %cst_69 : f32 to vector<16x128xf32>
    %179 = arith.select %175, %177, %178 : vector<16x128xi1>, vector<16x128xf32>
    %180 = arith.addf %173, %179 : vector<16x128xf32>
    %c12_i32 = arith.constant 12 : i32
    %181 = vector.broadcast %c12_i32 : i32 to vector<16x128xi32>
    %182 = arith.cmpi eq, %95, %181 : vector<16x128xi32>
    %cst_70 = arith.constant 0.000000e+00 : f32
    %183 = vector.shape_cast %94 : vector<1x128xf32> to vector<1x128xf32>
    %184 = vector.broadcast %183 : vector<1x128xf32> to vector<16x128xf32>
    %185 = vector.broadcast %cst_70 : f32 to vector<16x128xf32>
    %186 = arith.select %182, %184, %185 : vector<16x128xi1>, vector<16x128xf32>
    %187 = arith.addf %180, %186 : vector<16x128xf32>
    %c0_71 = arith.constant 0 : index
    %c0_72 = arith.constant 0 : index
    %c0_73 = arith.constant 0 : index
    %c0_74 = arith.constant 0 : index
    %188 = vector.load %arg5[%c0_71, %c0_72, %c0_73, %c0_74] : memref<1x1x16x128xf32, #tpu.memory_space<vmem>>, vector<1x1x16x128xf32>
    %189 = vector.shape_cast %188 : vector<1x1x16x128xf32> to vector<16x128xf32>
    %190 = arith.addf %189, %187 : vector<16x128xf32>
    %c0_75 = arith.constant 0 : index
    %c0_76 = arith.constant 0 : index
    %c0_77 = arith.constant 0 : index
    %c0_78 = arith.constant 0 : index
    %191 = vector.load %arg5[%c0_75, %c0_76, %c0_77, %c0_78] : memref<1x1x16x128xf32, #tpu.memory_space<vmem>>, vector<1x1x16x128xf32>
    %192 = vector.shape_cast %191 : vector<1x1x16x128xf32> to vector<16x128xf32>
    %193 = vector.shape_cast %190 : vector<16x128xf32> to vector<1x1x16x128xf32>
    tpu.vector_store %arg5[%c0_75, %c0_76, %c0_77, %c0_78], %193 {strides = array<i32>} : memref<1x1x16x128xf32, #tpu.memory_space<vmem>>, vector<1x1x16x128xf32>,
    return
  }
  func.func @transform_0(%arg0: i32, %arg1: i32, %arg2: i32) -> (i32, i32, i32, i32) {
    %c1_i32 = arith.constant 1 : i32
    %0 = arith.muli %arg1, %c1_i32 : i32
    %1 = arith.addi %0, %arg2 : i32
    %c0_i32 = arith.constant 0 : i32
    %2 = arith.minsi %1, %c0_i32 : i32
    %c0_i32_0 = arith.constant 0 : i32
    %c0_i32_1 = arith.constant 0 : i32
    %c0_i32_2 = arith.constant 0 : i32
    return %arg0, %c0_i32_0, %2, %c0_i32_1 : i32, i32, i32, i32
  }
  func.func @transform_1(%arg0: i32, %arg1: i32, %arg2: i32) -> (i32, i32, i32) {
    %c1_i32 = arith.constant 1 : i32
    %0 = arith.muli %arg1, %c1_i32 : i32
    %1 = arith.addi %0, %arg2 : i32
    %c0_i32 = arith.constant 0 : i32
    %2 = arith.minsi %1, %c0_i32 : i32
    %c0_i32_0 = arith.constant 0 : i32
    %c0_i32_1 = arith.constant 0 : i32
    return %arg0, %2, %c0_i32_0 : i32, i32, i32
  }
  func.func @transform_2(%arg0: i32, %arg1: i32, %arg2: i32) -> (i32, i32, i32, i32) {
    %c0_i32 = arith.constant 0 : i32
    %c0_i32_0 = arith.constant 0 : i32
    %c0_i32_1 = arith.constant 0 : i32
    return %arg0, %arg1, %c0_i32, %c0_i32_0 : i32, i32, i32, i32
  }
}

</mosaic_0001>

<bundles_post_ra>
// kernel: dice_loss_w_softmax.1
= control target key start
LH: loop header
LB: loop body
LE: loop exit
PB: predicated region body
PF: predicated region fallthrough
CT: control target
= control target key end

     0   :  { %s695_s9 = smov 0   ;;  %s697_s10 = smov 0   ;;  %s837_s0 = inlined_call_operand.vmem [shape: f32[2,4,2,128], index: 0, kind: input, shape index: {}]   ;;  %s838_s1 = inlined_call_operand.vmem [shape: f32[2,2,128], index: 1, kind: input, shape index: {}]   ;;  %s839_s2 = inlined_call_operand.vmem [shape: f32[2,1,16,128], index: 2, kind: output, shape index: {}]  }
   0x1   :  { %s699_s11 = smov 0  }
   0x2 LB: > { %s31_s12 = sadd.s32 1, %s673_s10  ;;  %p601_p0 = scmp.ge.s32.totalorder %s677_s11, 1  ;;  %s677_s11 = sphi %s699_s11, %s12_s11   ;;  %s673_s10 = sphi %s697_s10, %s841_s10   ;;  %s669_s9 = sphi %s695_s9, %s840_s9  }
   0x3   : > { %p33_p1 = scmp.ge.s32.totalorder %s31_s12, 2  ;;  %p176_p2 = scmp.lt.s32.totalorder %s677_s11, 3 }
   0x5   : > { %s843_s12 = smov (%p33_p1, %s31_s12), 0  ;;  %p177_p3 = pnand %p601_p0, %p176_p2 }
   0x6   : > { %p221_p4 = scmp.lt.s32.totalorder (!%p177_p3), %s669_s9, 1  ;;  %v679_v16 = vmov (!%p177_p3), 0.0   ;;  %vm292_vm3 = vcmask (!%p177_p3), 1041408   ;;  %v403_v39 = vlaneseq (!%p177_p3) }
   0x7   : > { %180 = sbr.rel (%p177_p3) target bundleno = 93 (0x5d), region = 28 }
   0x8   : > { %v753_v44 = vshrl.u32 (!%p177_p3), %v403_v39, 7 }
   0xa   : > { %v763_v50 = vadd.s32 (!%p177_p3), 8, %v753_v44  ;;  %vm406_vm5 = vcmp.eq.s32.totalorder (!%p177_p3), %v753_v44, 0  ;;  %vm412_vm6 = vcmp.eq.s32.totalorder (!%p177_p3), %v753_v44, 1  ;;  %vm418_vm7 = vcmp.eq.s32.totalorder (!%p177_p3), %v753_v44, 2 }
   0xb   : > { %vm424_vm9 = vcmp.eq.s32.totalorder (!%p177_p3), %v753_v44, 3  ;;  %vm430_vm10 = vcmp.eq.s32.totalorder (!%p177_p3), %v753_v44, 4  ;;  %vm436_vm12 = vcmp.eq.s32.totalorder (!%p177_p3), %v753_v44, 5  ;;  %vm442_vm13 = vcmp.eq.s32.totalorder (!%p177_p3), %v753_v44, 6 }
   0xc   : > { %vm455_vm8 = vcmp.eq.s32.totalorder (!%p177_p3), %v763_v50, 8  ;;  %vm461_vm11 = vcmp.eq.s32.totalorder (!%p177_p3), %v763_v50, 9  ;;  %vm467_vm14 = vcmp.eq.s32.totalorder (!%p177_p3), %v763_v50, 10  ;;  %vm448_vm15 = vcmp.eq.s32.totalorder (!%p177_p3), %v753_v44, 7 }
   0xe   : > { %s845_s9 = smov (!%p221_p4, %s669_s9), 1 }
   0xf   : > { %s616_s13 = sshll.u32 %s845_s9, 3  ;;  %s604_s17 = sshll.u32 %s845_s9, 1 }
  0x10   : > { %s228_s16 = scalar_lea.vmem %s837_s0, %s616_s13  ;;  %s241_s20 = scalar_lea.vmem %s838_s1, %s604_s17 }
  0x11   : > { %v719_v0 = vld [vmem:[%s228_s16] sm:$0x3]  ;;  %v607_v1 = vld [vmem:[%s228_s16 + $0x2] sm:$0x3]  ;;  %v608_v3 = vld [vmem:[%s228_s16 + $0x4] sm:$0x3] }
  0x12   : > { %v263_v2 = vmax.f32 %v719_v0, %v607_v1  ;;  %v609_v4 = vld [vmem:[%s228_s16 + $0x6] sm:$0x3]  ;;  %v733_v15 = vld [vmem:[%s241_s20] sm:$0x3]  ;;  %s617_s21 = sshll.u32 %s845_s9, 4 }
  0x13   : > { %vm290_vm0 = vcmp.eq.f32.partialorder %v733_v15, 0.0  ;;  %vm317_vm1 = vcmp.eq.f32.partialorder %v733_v15, 1.0  ;;  %vm343_vm2 = vcmp.eq.f32.partialorder %v733_v15, 2.0  ;;  %vm369_vm4 = vcmp.eq.f32.partialorder %v733_v15, 3.0  ;;  %s253_s24 = scalar_lea.vmem %s839_s2, %s617_s21 }
  0x14   : > { %v266_v5 = vmax.f32 %v263_v2, %v608_v3  ;;  %v610_v17 = vsel %vm290_vm0, 1.0, %v679_v16  ;;  %v611_v18 = vsel %vm317_vm1, 1.0, %v679_v16  ;;  %v612_v19 = vsel %vm343_vm2, 1.0, %v679_v16 }
  0x15   : > { %v309_v22 = vsel %vm292_vm3, %v610_v17, 0.0  ;;  %v335_v23 = vsel %vm292_vm3, %v611_v18, 0.0  ;;  %v361_v24 = vsel %vm292_vm3, %v612_v19, 0.0  ;;  %v613_v28 = vsel %vm369_vm4, 1.0, %v679_v16 }
  0x16   : > { %v722_v6 = vmax.f32 %v266_v5, %v609_v4  ;;  %v310_v30 = vrot.slane %v309_v22, 4  ;;  %v336_v31 = vrot.slane %v335_v23, 4  ;;  %v362_v32 = vrot.slane %v361_v24, 4 }
  0x17   : > { %v387_v34 = vsel %vm292_vm3, %v613_v28, 0.0 }
  0x18   : > { %v270_v7 = vsub.f32 %v719_v0, %v722_v6  ;;  %v273_v8 = vsub.f32 %v607_v1, %v722_v6  ;;  %v277_v9 = vsub.f32 %v608_v3, %v722_v6  ;;  %v281_v10 = vsub.f32 %v609_v4, %v722_v6 }
  0x19   : > { %v311_v35 = vadd.f32 %v310_v30, %v309_v22  ;;  %v337_v36 = vadd.f32 %v336_v31, %v335_v23  ;;  %v363_v37 = vadd.f32 %v362_v32, %v361_v24  ;;  %v388_v38 = vrot.slane %v387_v34, 4 }
  0x1a   : > { %v271_v11 = vmul.f32 1.442695, %v270_v7  ;;  %v274_v12 = vmul.f32 1.442695, %v273_v8  ;;  %v278_v13 = vmul.f32 1.442695, %v277_v9 }
  0x1b   : > { %v282_v14 = vmul.f32 1.442695, %v281_v10  ;;  %v312_v40 = vrot.slane %v311_v35, 2  ;;  %v338_v41 = vrot.slane %v337_v36, 2  ;;  %v364_v42 = vrot.slane %v363_v37, 2 }
  0x1c   : > { %643 = vpow2.f32 %v271_v11  ;;  %v751_v43 = vadd.f32 %v388_v38, %v387_v34 }
  0x1d   : > { %645 = vpow2.f32 %v274_v12  ;;  %v755_v45 = vadd.f32 %v312_v40, %v311_v35  ;;  %v757_v46 = vadd.f32 %v338_v41, %v337_v36  ;;  %v759_v47 = vadd.f32 %v364_v42, %v363_v37 }
  0x1e   : > { %647 = vpow2.f32 %v278_v13  ;;  %v390_v49 = vrot.slane %v751_v43, 2 }
  0x1f   : > { %649 = vpow2.f32 %v282_v14  ;;  %v314_v55 = vrot.slane %v755_v45, 1  ;;  %v340_v56 = vrot.slane %v757_v46, 1  ;;  %v366_v57 = vrot.slane %v759_v47, 1 }
  0x20   : > { %v391_v36 = vadd.f32 %v390_v49, %v751_v43 }
  0x21   : > { %v341_v43 = vadd.f32 %v340_v56, %v757_v46 }
  0x22   : > { %v392_v56 = vrot.slane %v391_v36, 1 }
  0x26   : > { %v644_v20 = vpop.eup %643 }
  0x27   : > { %v646_v21 = vpop.eup %645 }
  0x28   : > { %v648_v25 = vpop.eup %647  ;;  %v276_v26 = vadd.f32 %v646_v21, %v644_v20 }
  0x29   : > { %v650_v27 = vpop.eup %649 }
  0x2a   : > { %v280_v29 = vadd.f32 %v648_v25, %v276_v26 }
  0x2c   : > { %v284_v33 = vadd.f32 %v650_v27, %v280_v29 }
  0x2e   : > { %651 = vrcp.f32 %v284_v33 }
  0x2f   : > { %653 = vlog2.f32 %v284_v33 }
  0x38   : > { %v652_v48 = vpop.eup %651 }
  0x39   : > { %v289_v51 = vmul.f32 %v652_v48, %v644_v20  ;;  %v316_v52 = vmul.f32 %v652_v48, %v646_v21  ;;  %v342_v53 = vmul.f32 %v652_v48, %v648_v25  ;;  %v368_v54 = vmul.f32 %v652_v48, %v650_v27  ;;  %v654_v15 = vpop.eup %653 }
  0x3a   : > { %v287_v48 = vmul.f32 0.6931472, %v654_v15 }
  0x3b   : > { %v291_v58 = vsel %vm290_vm0, %v289_v51, 0.0  ;;  %v318_v59 = vsel %vm317_vm1, %v316_v52, 0.0  ;;  %v300_v60 = vsel %vm292_vm3, %v289_v51, 0.0  ;;  %v326_v61 = vsel %vm292_vm3, %v316_v52, 0.0 }
  0x3c   : > { %v293_v62 = vsel %vm292_vm3, %v291_v58, 0.0  ;;  %v319_v63 = vsel %vm292_vm3, %v318_v59, 0.0  ;;  %v301_v1 = vrot.slane %v300_v60, 4  ;;  %v327_v2 = vrot.slane %v326_v61, 4 }
  0x3d   : > { %v294_v3 = vrot.slane %v293_v62, 4  ;;  %v320_v4 = vrot.slane %v319_v63, 4  ;;  %v344_v5 = vsel %vm343_vm2, %v342_v53, 0.0  ;;  %v352_v7 = vsel %vm292_vm3, %v342_v53, 0.0 }
  0x3e   : > { %v302_v8 = vadd.f32 %v301_v1, %v300_v60  ;;  %v328_v9 = vadd.f32 %v327_v2, %v326_v61  ;;  %v345_v10 = vsel %vm292_vm3, %v344_v5, 0.0  ;;  %v353_v11 = vrot.slane %v352_v7, 4 }
  0x3f   : > { %v295_v12 = vadd.f32 %v294_v3, %v293_v62  ;;  %v321_v13 = vadd.f32 %v320_v4, %v319_v63  ;;  %v346_v14 = vrot.slane %v345_v10, 4  ;;  %v370_v16 = vsel %vm369_vm4, %v368_v54, 0.0 }
  0x40   : > { %v303_v17 = vrot.slane %v302_v8, 2  ;;  %v329_v18 = vrot.slane %v328_v9, 2  ;;  %v354_v19 = vadd.f32 %v353_v11, %v352_v7  ;;  %v371_v20 = vsel %vm292_vm3, %v370_v16, 0.0 }
  0x41   : > { %v296_v21 = vrot.slane %v295_v12, 2  ;;  %v322_v22 = vrot.slane %v321_v13, 2  ;;  %v347_v23 = vadd.f32 %v346_v14, %v345_v10  ;;  %v372_v24 = vrot.slane %v371_v20, 4 }
  0x42   : > { %v304_v25 = vadd.f32 %v303_v17, %v302_v8  ;;  %v330_v26 = vadd.f32 %v329_v18, %v328_v9  ;;  %v355_v27 = vrot.slane %v354_v19, 2  ;;  %v378_v28 = vsel %vm292_vm3, %v368_v54, 0.0 }
  0x43   : > { %v297_v29 = vadd.f32 %v296_v21, %v295_v12  ;;  %v323_v30 = vadd.f32 %v322_v22, %v321_v13  ;;  %v348_v31 = vrot.slane %v347_v23, 2  ;;  %v373_v32 = vadd.f32 %v372_v24, %v371_v20 }
  0x44   : > { %v305_v33 = vrot.slane %v304_v25, 1  ;;  %v356_v34 = vadd.f32 %v355_v27, %v354_v19  ;;  %v379_v35 = vrot.slane %v378_v28, 4  ;;  %v331_v41 = vrot.slane %v330_v26, 1 }
  0x45   : > { %v298_v37 = vrot.slane %v297_v29, 1  ;;  %v324_v38 = vrot.slane %v323_v30, 1  ;;  %v349_v39 = vadd.f32 %v348_v31, %v347_v23  ;;  %v374_v40 = vrot.slane %v373_v32, 2 }
  0x46   : > { %v380_v42 = vadd.f32 %v379_v35, %v378_v28  ;;  %v315_v51 = vadd.f32 %v314_v55, %v755_v45  ;;  %v306_v59 = vadd.f32 %v305_v33, %v304_v25  ;;  %v357_v60 = vrot.slane %v356_v34, 1 }
  0x47   : > { %v299_v52 = vadd.f32 %v298_v37, %v297_v29  ;;  %v325_v53 = vadd.f32 %v324_v38, %v323_v30  ;;  %v350_v54 = vrot.slane %v349_v39, 1  ;;  %v375_v58 = vadd.f32 %v374_v40, %v373_v32 }
  0x48   : > { %v381_v61 = vrot.slane %v380_v42, 2  ;;  %v367_v2 = vadd.f32 %v366_v57, %v759_v47  ;;  %v394_v3 = vadd.f32 %v287_v48, %v722_v6  ;;  %v332_v4 = vadd.f32 %v331_v41, %v330_v26 }
  0x49   : > { %v351_v49 = vadd.f32 %v350_v54, %v349_v39  ;;  %v376_v62 = vrot.slane %v375_v58, 1  ;;  %v408_v63 = vsel %vm406_vm5, %v299_v52, 0.0  ;;  %v414_v1 = vsel %vm412_vm6, %v325_v53, 0.0 }
  0x4a   : > { %v382_v45 = vadd.f32 %v381_v61, %v380_v42  ;;  %v416_v55 = vadd.f32 %v414_v1, %v408_v63  ;;  %v395_v9 = vsub.f32 %v394_v3, %v719_v0  ;;  %v457_v10 = vsel %vm455_vm8, %v315_v51, 0.0 }
  0x4b   : > { %v377_v5 = vadd.f32 %v376_v62, %v375_v58  ;;  %v420_v46 = vsel %vm418_vm7, %v351_v49, 0.0  ;;  %v358_v11 = vadd.f32 %v357_v60, %v356_v34  ;;  %v432_v6 = vsel %vm430_vm10, %v306_v59, 0.0 }
  0x4c   : > { %v383_v7 = vrot.slane %v382_v45, 1  ;;  %v422_v8 = vadd.f32 %v420_v46, %v416_v55  ;;  %v463_v47 = vsel %vm461_vm11, %v341_v43, 0.0  ;;  %v396_v13 = vsel %vm292_vm3, %v395_v9, 0.0 }
  0x4d   : > { %v426_v12 = vsel %vm424_vm9, %v377_v5, 0.0  ;;  %v438_v14 = vsel %vm436_vm12, %v332_v4, 0.0  ;;  %v397_v16 = vrot.slane %v396_v13, 4  ;;  %v465_v18 = vadd.f32 %v463_v47, %v457_v10 }
  0x4e   : > { %v428_v57 = vadd.f32 %v426_v12, %v422_v8  ;;  %v384_v0 = vadd.f32 %v383_v7, %v382_v45  ;;  %v444_v19 = vsel %vm442_vm13, %v358_v11, 0.0  ;;  %v393_v20 = vadd.f32 %v392_v56, %v391_v36 }
  0x4f   : > { %v398_v21 = vadd.f32 %v397_v16, %v396_v13  ;;  %v469_v22 = vsel %vm467_vm14, %v367_v2, 0.0  ;;  %vm473_vm0 = vcmp.eq.s32.totalorder %v763_v50, 11  ;;  %vm479_vm1 = vcmp.eq.s32.totalorder %v763_v50, 12 }
  0x50   : > { %v434_v17 = vadd.f32 %v432_v6, %v428_v57  ;;  %v450_v24 = vsel %vm448_vm15, %v384_v0, 0.0  ;;  %v471_v27 = vadd.f32 %v469_v22, %v465_v18  ;;  %v475_v15 = vsel %vm473_vm0, %v393_v20, 0.0 }
  0x51   : > { %v399_v25 = vrot.slane %v398_v21, 2 }
  0x52   : > { %v440_v23 = vadd.f32 %v438_v14, %v434_v17  ;;  %v477_v30 = vadd.f32 %v475_v15, %v471_v27 }
  0x53   : > { %v400_v28 = vadd.f32 %v399_v25, %v398_v21 }
  0x54   : > { %v446_v26 = vadd.f32 %v444_v19, %v440_v23 }
  0x55   : > { %v401_v44 = vrot.slane %v400_v28, 1 }
  0x56   : > { %v452_v29 = vadd.f32 %v450_v24, %v446_v26 }
  0x57   : > { %v402_v31 = vadd.f32 %v401_v44, %v400_v28 }
  0x58   : > { %488 = vst [vmem:[%s253_s24] sm:$0xff] %v452_v29 }
  0x59   : > { %v481_v32 = vsel %vm479_vm1, %v402_v31, 0.0 }
  0x5a   : > { %v483_v33 = vadd.f32 %v481_v32, %v477_v30 }
  0x5c   : > { %489 = vst [vmem:[%s253_s24 + $0x8] sm:$0xff] %v483_v33 }
  0x5d PF: > { %s12_s11 = sadd.s32 1, %s677_s11   ;;  %s840_s9 = smov %s673_s10 }
  0x5e   : > { %p9_p5 = scmp.ge.s32.totalorder %s12_s11, 4   ;;  %s841_s10 = smov %s843_s12 }
  0x60   :  { %11 = sbr.rel (!%p9_p5) target bundleno = 2 (0x2), region = 68 }

</bundles_post_ra>
